<compile_context>
chip_gen: v6e
topology: v6e:2x2x1
jax: 0.10.0
libtpu: 0.0.40
codegen_flags: <defaults>
</compile_context>

<pallas_src>
import jax
import jax.numpy as jnp
from jax.experimental import pallas as pl
from jax.experimental.pallas import tpu as pltpu


def _round_up(n, m):
    return ((n + m - 1) // m) * m


def _choose_tile(batch, block_b):
    """Pick a batch tile (multiple of 8) and tile count (>=2, even when >1)."""
    n = max(1, -(-batch // block_b))
    if n == 1 and batch >= 16:
        n = 2                       # keep both v7x TensorCores busy
    if n > 1 and (n % 2):
        n += 1                      # even tile count -> balanced megacore split
    tb = _round_up(max(8, -(-batch // n)), 8)
    n = -(-batch // tb)
    return tb, n


# ----------------------------------------------------------------------------
# Primary kernel: centers VMEM-resident, label selection via one-hot mask.
# ----------------------------------------------------------------------------
def _make_resident_kernel(true_b, tb, c_pad):
    def kernel(x_ref, lab_ref, ct_ref, o_ref):
        # x_ref  : (tb, D)      batch tile of features (auto double-buffered)
        # lab_ref: (tb, 1)      int32 labels column for this tile
        # ct_ref : (D, c_pad)   centers^T, constant index_map -> VMEM-resident
        # o_ref  : (1, 1, 1)    per-tile partial sum
        i = pl.program_id(0)

        x = x_ref[...].astype(jnp.float32)                       # (tb, D)
        ct = ct_ref[...].astype(jnp.float32)                     # (D, c_pad)
        lab = lab_ref[...]                                       # (tb, 1)

        x_sq = jnp.sum(x * x, axis=1, keepdims=True)             # (tb, 1)
        c_sq = jnp.sum(ct * ct, axis=0, keepdims=True)           # (1, c_pad)
        cross = jnp.dot(x, ct, preferred_element_type=jnp.float32)  # MXU (tb, c_pad)

        # Same algebraic form as the PyTorch module, full row of distmat.
        distm = x_sq + (c_sq - 2.0 * cross)                      # (tb, c_pad)

        # One-hot select the label column (mirrors labels.eq(classes) mask).
        classes = jax.lax.broadcasted_iota(jnp.int32, (tb, c_pad), 1)
        onehot = lab == classes
        d = jnp.sum(jnp.where(onehot, distm, 0.0), axis=1, keepdims=True)
        d = jnp.clip(d, 1e-12, 1e12)

        # Mask padded rows of the last tile out of the partial sum.
        row = i * tb + jax.lax.broadcasted_iota(jnp.int32, (tb, 1), 0)
        d = jnp.where(row < true_b, d, 0.0)

        o_ref[...] = jnp.reshape(jnp.sum(d), (1, 1, 1))

    return kernel


# ----------------------------------------------------------------------------
# Fallback kernel (very large center tables): centers[labels] gathered by XLA
# in the wrapper, kernel streams x / gathered-center tiles (pure VPU).
# ----------------------------------------------------------------------------
def _make_gathered_kernel(true_b, tb):
    def kernel(x_ref, cg_ref, o_ref):
        i = pl.program_id(0)
        x = x_ref[...].astype(jnp.float32)                       # (tb, D)
        c = cg_ref[...].astype(jnp.float32)                      # (tb, D)

        d = (jnp.sum(x * x, axis=1, keepdims=True)
             + jnp.sum(c * c, axis=1, keepdims=True)
             - 2.0 * jnp.sum(x * c, axis=1, keepdims=True))
        d = jnp.clip(d, 1e-12, 1e12)

        row = i * tb + jax.lax.broadcasted_iota(jnp.int32, (tb, 1), 0)
        d = jnp.where(row < true_b, d, 0.0)

        o_ref[...] = jnp.reshape(jnp.sum(d), (1, 1, 1))

    return kernel


def proximity_loss(x, centers, labels, *, block_b=512, use_resident=None):
    """x: (B, D), centers: (C, D), labels: (B,) int -> scalar f32 loss."""
    B, D = x.shape
    C, Dc = centers.shape
    assert D == Dc, "feat_dim mismatch between x and centers"

    labels = jnp.clip(labels.astype(jnp.int32), 0, C - 1)

    tb, n = _choose_tile(B, block_b)
    b_pad = n * tb
    if b_pad != B:
        x = jnp.pad(x, ((0, b_pad - B), (0, 0)))
        labels = jnp.pad(labels, (0, b_pad - B))   # padded rows masked in-kernel

    # Generation-specific VMEM budget (v7x: 64 MiB/TC, v5e/v6e: 128 MiB).
    try:
        vmem_cap = int(pltpu.get_tpu_info().vmem_capacity_bytes)
    except Exception:
        vmem_cap = 64 * 1024 * 1024               # v7x-safe assumption

    c_pad = _round_up(C, 128)                     # lane-dense class axis
    c_item = jnp.dtype(centers.dtype).itemsize
    x_item = jnp.dtype(x.dtype).itemsize

    resident_need = (2 * D * c_pad * c_item       # centers (allow double buffer)
                     + 2 * tb * D * x_item        # x tiles, double-buffered
                     + 2 * tb * 128 * 4           # labels tiles (lane-padded)
                     + tb * D * 4                 # f32 temp of x
                     + 2 * tb * c_pad * 4         # distmat / one-hot temps
                     + (4 << 20))                 # headroom
    if use_resident is None:
        use_resident = resident_need <= vmem_cap // 2

    dim_sem = pltpu.CompilerParams(
        dimension_semantics=("parallel",),
        vmem_limit_bytes=min(max(32 * 1024 * 1024,
                                 resident_need if use_resident
                                 else (4 * tb * D * 4 + 2 * tb * D * x_item + (4 << 20))),
                             3 * vmem_cap // 4),
    )

    if use_resident:
        centers_p = centers
        if c_pad != C:
            centers_p = jnp.pad(centers, ((0, c_pad - C), (0, 0)))
        centers_t = centers_p.T                   # (D, c_pad): wrapper-side layout plumbing

        kernel = _make_resident_kernel(B, tb, c_pad)
        partials = pl.pallas_call(
            kernel,
            grid=(n,),
            in_specs=[
                pl.BlockSpec((tb, D), lambda i: (i, 0)),       # x tile (pipelined)
                pl.BlockSpec((tb, 1), lambda i: (i, 0)),       # labels column tile
                pl.BlockSpec((D, c_pad), lambda i: (0, 0)),    # centers^T: VMEM-resident
            ],
            out_specs=pl.BlockSpec((1, 1, 1), lambda i: (i, 0, 0)),
            out_shape=jax.ShapeDtypeStruct((n, 1, 1), jnp.float32),
            compiler_params=dim_sem,
        )(x, labels[:, None], centers_t)
    else:
        # Very large center table: gather once with XLA, stream through VPU kernel.
        cg = jnp.take(centers, labels, axis=0)                  # (b_pad, D)
        kernel = _make_gathered_kernel(B, tb)
        partials = pl.pallas_call(
            kernel,
            grid=(n,),
            in_specs=[
                pl.BlockSpec((tb, D), lambda i: (i, 0)),
                pl.BlockSpec((tb, D), lambda i: (i, 0)),
            ],
            out_specs=pl.BlockSpec((1, 1, 1), lambda i: (i, 0, 0)),
            out_shape=jax.ShapeDtypeStruct((n, 1, 1), jnp.float32),
            compiler_params=dim_sem,
        )(x, cg)

    # Per-tile partial sums -> scalar mean over the true batch size.
    return jnp.sum(partials) / jnp.float32(B)


def _reference(x, centers, labels):
    x = x.astype(jnp.float32)
    centers = centers.astype(jnp.float32)
    x_sq = jnp.sum(x * x, axis=1, keepdims=True)
    c_sq = jnp.sum(centers * centers, axis=1)[None, :]
    distmat = x_sq + c_sq - 2.0 * (x @ centers.T)
    picked = jnp.take_along_axis(distmat, labels[:, None].astype(jnp.int32), axis=1)[:, 0]
    picked = jnp.clip(picked, 1e-12, 1e12)
    return jnp.mean(picked)


if __name__ == "__main__":
    # Small shapes consistent with the module (num_classes / feat_dim scaled down).
    B, C, D = 20, 16, 256
    key = jax.random.PRNGKey(0)
    kx, kc, kl = jax.random.split(key, 3)

    x = jax.random.normal(kx, (B, D), dtype=jnp.float32)
    centers = jax.random.normal(kc, (C, D), dtype=jnp.float32)   # torch.randn(C, D) analog
    labels = jax.random.randint(kl, (B,), 0, C, dtype=jnp.int32)

    ref = _reference(x, centers, labels)

    # Primary path: VMEM-resident centers, default (large) batch tile -> grid of 2.
    loss_resident = jax.block_until_ready(proximity_loss(x, centers, labels))
    assert jnp.allclose(loss_resident, ref, rtol=1e-4, atol=1e-4), (loss_resident, ref)

    # Fallback path (exercised with a tiny tile so multi-step grid + padding run too).
    loss_fallback = jax.block_until_ready(
        proximity_loss(x, centers, labels, block_b=8, use_resident=False))
    assert jnp.allclose(loss_fallback, ref, rtol=1e-4, atol=1e-4), (loss_fallback, ref)

    print("KERNEL_OK")
</pallas_src>

<mosaic_0001>
module attributes {stable_mosaic.version = 11 : i64} {
  func.func @kernel(%arg0: i32, %arg1: memref<16x256xf32, #tpu.memory_space<vmem>>, %arg2: memref<16x1xi32, #tpu.memory_space<vmem>>, %arg3: memref<256x128xf32, #tpu.memory_space<vmem>>, %arg4: memref<1x1x1xf32, #tpu.memory_space<vmem>>) attributes {dimension_semantics = [#tpu.dimension_semantics<parallel>], iteration_bounds = array<i64: 2>, scalar_prefetch = 0 : i64, scratch_operands = 0 : i64, tpu.core_type = #tpu.core_type<tc>, window_params = [{transform_indices = @transform_0, window_bounds = array<i64: 16, 256>}, {transform_indices = @transform_1, window_bounds = array<i64: 16, 1>}, {pipeline_mode = #tpu.pipeline_mode<synchronous>, transform_indices = @transform_2, window_bounds = array<i64: 256, 128>}, {transform_indices = @transform_3, window_bounds = array<i64: 1, 1, 1>}]} {
    %c0 = arith.constant 0 : index
    %c0_0 = arith.constant 0 : index
    %0 = vector.load %arg1[%c0, %c0_0] : memref<16x256xf32, #tpu.memory_space<vmem>>, vector<16x256xf32>
    %c0_1 = arith.constant 0 : index
    %c0_2 = arith.constant 0 : index
    %1 = vector.load %arg3[%c0_1, %c0_2] : memref<256x128xf32, #tpu.memory_space<vmem>>, vector<256x128xf32>
    %c0_3 = arith.constant 0 : index
    %c0_4 = arith.constant 0 : index
    %2 = vector.load %arg2[%c0_3, %c0_4] : memref<16x1xi32, #tpu.memory_space<vmem>>, vector<16x1xi32>
    %3 = arith.mulf %0, %0 : vector<16x256xf32>
    %cst = arith.constant dense<0.000000e+00> : vector<16xf32>
    %4 = vector.multi_reduction <add>, %3, %cst [1] : vector<16x256xf32> to vector<16xf32>
    %5 = vector.shape_cast %4 : vector<16xf32> to vector<16x1xf32>
    %6 = arith.mulf %1, %1 : vector<256x128xf32>
    %cst_5 = arith.constant dense<0.000000e+00> : vector<128xf32>
    %7 = vector.multi_reduction <add>, %6, %cst_5 [0] : vector<256x128xf32> to vector<128xf32>
    %8 = vector.shape_cast %7 : vector<128xf32> to vector<1x128xf32>
    %cst_6 = arith.constant dense<0.000000e+00> : vector<16x128xf32>
    %9 = tpu.matmul %0, %1, %cst_6 {dimension_numbers = #tpu.dot_dimension_numbers<[1], [0], [0], [1], [0, 0, 1, 1], [], []>} : vector<16x256xf32>, vector<256x128xf32>, vector<16x128xf32> -> vector<16x128xf32>
    %cst_7 = arith.constant 2.000000e+00 : f32
    %10 = vector.broadcast %cst_7 : f32 to vector<16x128xf32>
    %11 = arith.mulf %10, %9 : vector<16x128xf32>
    %12 = vector.broadcast %8 : vector<1x128xf32> to vector<16x128xf32>
    %13 = arith.subf %12, %11 : vector<16x128xf32>
    %14 = vector.broadcast %5 : vector<16x1xf32> to vector<16x128xf32>
    %15 = arith.addf %14, %13 : vector<16x128xf32>
    %16 = tpu.iota {dimensions = array<i32: 1>} : vector<16x128xi32>
    %17 = vector.broadcast %2 : vector<16x1xi32> to vector<16x128xi32>
    %18 = arith.cmpi eq, %17, %16 : vector<16x128xi32>
    %cst_8 = arith.constant 0.000000e+00 : f32
    %19 = vector.broadcast %cst_8 : f32 to vector<16x128xf32>
    %20 = arith.select %18, %15, %19 : vector<16x128xi1>, vector<16x128xf32>
    %cst_9 = arith.constant dense<0.000000e+00> : vector<16xf32>
    %21 = vector.multi_reduction <add>, %20, %cst_9 [1] : vector<16x128xf32> to vector<16xf32>
    %22 = vector.shape_cast %21 : vector<16xf32> to vector<16x1xf32>
    %cst_10 = arith.constant 9.99999996E-13 : f32
    %cst_11 = arith.constant 9.99999995E+11 : f32
    %23 = vector.broadcast %cst_10 : f32 to vector<16x1xf32>
    %24 = arith.maximumf %23, %22 : vector<16x1xf32>
    %25 = vector.broadcast %cst_11 : f32 to vector<16x1xf32>
    %26 = arith.minimumf %25, %24 : vector<16x1xf32>
    %c16_i32 = arith.constant 16 : i32
    %27 = arith.muli %arg0, %c16_i32 : i32
    %28 = tpu.iota {dimensions = array<i32: 0>} : vector<16x1xi32>
    %29 = vector.broadcast %27 : i32 to vector<16x1xi32>
    %30 = arith.addi %29, %28 : vector<16x1xi32>
    %c20_i32 = arith.constant 20 : i32
    %31 = vector.broadcast %c20_i32 : i32 to vector<16x1xi32>
    %32 = arith.cmpi slt, %30, %31 : vector<16x1xi32>
    %cst_12 = arith.constant 0.000000e+00 : f32
    %33 = vector.broadcast %cst_12 : f32 to vector<16x1xf32>
    %34 = arith.select %32, %26, %33 : vector<16x1xi1>, vector<16x1xf32>
    %35 = vector.shape_cast %34 : vector<16x1xf32> to vector<1x16x1xf32>
    %cst_13 = arith.constant dense<0.000000e+00> : vector<1xf32>
    %36 = vector.multi_reduction <add>, %35, %cst_13 [1, 2] : vector<1x16x1xf32> to vector<1xf32>
    %37 = vector.shape_cast %36 : vector<1xf32> to vector<1x1x1xf32>
    %38 = vector.extract %37[0, 0, 0] : f32 from vector<1x1x1xf32>
    %39 = vector.broadcast %38 : f32 to vector<1x1x1xf32>
    %c0_14 = arith.constant 0 : index
    %c0_15 = arith.constant 0 : index
    %c0_16 = arith.constant 0 : index
    %40 = vector.load %arg4[%c0_14, %c0_15, %c0_16] : memref<1x1x1xf32, #tpu.memory_space<vmem>>, vector<1x1x1xf32>
    tpu.vector_store %arg4[%c0_14, %c0_15, %c0_16], %39 {strides = array<i32>} : memref<1x1x1xf32, #tpu.memory_space<vmem>>, vector<1x1x1xf32>,
    return
  }
  func.func @transform_0(%arg0: i32) -> (i32, i32) {
    %c0_i32 = arith.constant 0 : i32
    %c0_i32_0 = arith.constant 0 : i32
    return %arg0, %c0_i32 : i32, i32
  }
  func.func @transform_1(%arg0: i32) -> (i32, i32) {
    %c0_i32 = arith.constant 0 : i32
    %c0_i32_0 = arith.constant 0 : i32
    return %arg0, %c0_i32 : i32, i32
  }
  func.func @transform_2(%arg0: i32) -> (i32, i32) {
    %c0_i32 = arith.constant 0 : i32
    %c0_i32_0 = arith.constant 0 : i32
    %c0_i32_1 = arith.constant 0 : i32
    return %c0_i32, %c0_i32_0 : i32, i32
  }
  func.func @transform_3(%arg0: i32) -> (i32, i32, i32) {
    %c0_i32 = arith.constant 0 : i32
    %c0_i32_0 = arith.constant 0 : i32
    %c0_i32_1 = arith.constant 0 : i32
    return %arg0, %c0_i32, %c0_i32_0 : i32, i32, i32
  }
}

</mosaic_0001>

<bundles_post_ra>
// kernel: tpu_custom_call.1
= control target key start
LH: loop header
LB: loop body
LE: loop exit
PB: predicated region body
PF: predicated region fallthrough
CT: control target
= control target key end

     0   :  { %8 = vsyncpa [#allocation3], 0  ;;  %s1098_s0 = inlined_call_operand.hbm [shape: f32[32,256], index: 0, kind: input, shape index: {}]   ;;  %s1099_s1 = inlined_call_operand.vmem [shape: s32[32,1], index: 1, kind: input, shape index: {}]   ;;  %s1100_s2 = inlined_call_operand.hbm [shape: f32[256,128], index: 2, kind: input, shape index: {}]   ;;  %s1101_s3 = inlined_call_operand.vmem [shape: f32[2,1,1], index: 3, kind: output, shape index: {}]  }
   0x1   :  { %10 = vsyncpa [#allocation3 + $0x1], 0 }
   0x2   :  { %11 = vsyncpa [#allocation5], 0  ;;  %s820_s12 = smov 0   ;;  %s822_s13 = smov 0  }
   0x3   :  { %s824_s14 = smov 0   ;;  %s826_s15 = smov 0  }
   0x4 LB: > { %s839_s16 = sadd.s32 4294967295, %s791_s15   ;;  %p37_p0 = scmp.ne.s32.totalorder %s783_s13, %s779_s12  ;;  %s791_s15 = sphi %s826_s15, %s1117_s15   ;;  %s787_s14 = sphi %s824_s14, %s1116_s14   ;;  %s783_s13 = sphi %s822_s13, %s1115_s13   ;;  %s779_s12 = sphi %s820_s12, %s1114_s12  }
   0x5   : > { %p1102_p1 = scmp.eq.s32.totalorder %s839_s16, 0  ;;  %p553_p2 = scmp.ge.s32.totalorder %s791_s15, 1 }
   0x6   : > { %p121_p3 = scmp.lt.s32.totalorder %s791_s15, 3  ;;  %s793_s19 = smov [#allocation4]  }
   0x7   : > { %p847_p4 = por %p1102_p1, %p37_p0  ;;  %s133_s20 = sshll.u32 %s793_s19, 4  ;;  %s134_s20 = int_to_ptr.vmem [resolvable:$true] %s133_s20 }
   0x8   : > { %p851_p5 = pnand %p553_p2, %p121_p3  ;;  %s864_s22 = sadd.s32 1, %s791_s15  }
   0x9   : > { %s1105_s17 = scalar_select %p847_p4, 1, 0 }
   0xa   : > { %s1106_s18 = scalar_select %p851_p5, 1, 0 }
   0xb   : > { %p648_p6 = pneg %p851_p5  ;;  %s24_s23 = sadd.s32 1, %s787_s14 }
   0xc   : > { %s21_s24 = ssub.s32 %s791_s15, %s864_s22  ;;  %s710_s25 = scalar_lea.vmem %s134_s20, 4096 }
   0xd   : > { %p859_p7 = pnand %p648_p6, %p1102_p1  ;;  %p711_p9 = scmp.ne.s32.totalorder %s134_s20, %s710_s25 }
   0xe   : > { %p718_p12 = scmp.lt.s32.totalorder %s134_s20, %s134_s20  ;;  %p719_p13 = scmp.lt.s32.totalorder %s710_s25, %s710_s25 }
   0xf   : > { %p701_p8 = pneg %p859_p7 }
  0x10   : > { %p720_p0 = por %p719_p13, %p718_p12 }
  0x11   : > { %p713_p10 = pnand %p711_p9, %p701_p8 }
  0x13   : > { %p714_p11 = pneg %p713_p10 }
  0x15   : > { %p721_p2 = pnand %p720_p0, %p714_p11 }
  0x17   : > { %724 = shalt.err (!%p721_p2)
}
  0x18   : > { %s794_s26 = smov 128   ;;  %s795_s27 = smov 8  }
  0x19   : > { %651 = dma.hbm_to_vmem [thread:$0]  (!%p859_p7), %s1100_s2, 4096, %s134_s20, [#allocation5], %s794_s26, %s794_s26, %s795_s27  }
  0x1a   : > { %p22_p3 = scmp.eq.s32.totalorder %s21_s24, 0  ;;  %p31_p6 = scmp.ne.s32.totalorder %s787_s14, %s783_s13 }
  0x1b   : > { %p32_p8 = scmp.eq.s32.totalorder %s791_s15, 0  ;;  %p657_p9 = scmp.lt.s32.totalorder %s791_s15, 2 }
  0x1c   : > { %s881_s30 = scalar_select %p22_p3, %s787_s14, %s24_s23  }
  0x1d   : > { %p33_p10 = por %p32_p8, %p31_p6  ;;  %s147_s4 = sand.u32 1, %s787_s14  }
  0x1e   : > { %s556_s5 = sshll.u32 %s147_s4, 5  ;;  %s569_s6 = sshll.u32 %s791_s15, 9 }
  0x1f   : > { %s888_s9 = scalar_lea.hbm %s1098_s0, %s569_s6  ;;  %s151_s10 = scalar_lea.vmem [#allocation2], %s556_s5 }
  0x20   : > { %s159_s11 = sshll.u32 %s151_s10, 4  ;;  %p892_p7 = pnand %p657_p9, %p33_p10  ;;  %s890_s11 = int_to_ptr.vmem [resolvable:$true] %s159_s11 }
  0x21   : > { %s896_s19 = scalar_lea.sflag [#allocation3], %s147_s4  ;;  %s725_s15 = scalar_lea.hbm %s888_s9, 512 }
  0x22   : > { %p726_p11 = scmp.ne.s32.totalorder %s888_s9, %s725_s15  ;;  %p727_p12 = pneg %p892_p7 }
  0x23   : > { %s730_s23 = scalar_lea.hbm %s1098_s0, 1024  ;;  %p731_p2 = scmp.lt.s32.totalorder %s888_s9, %s1098_s0 }
  0x24   : > { %p728_p13 = pnand %p727_p12, %p726_p11  ;;  %p732_p3 = scmp.lt.s32.totalorder %s730_s23, %s725_s15 }
  0x26   : > { %p729_p0 = pneg %p728_p13  ;;  %p733_p6 = por %p732_p3, %p731_p2 }
  0x28   : > { %p734_p8 = pnand %p733_p6, %p729_p0 }
  0x2a   : > { %737 = shalt.err (!%p734_p8)
}
  0x2b   : > { %s738_s26 = scalar_lea.vmem %s890_s11, 512  ;;  %s796_s27 = smov [#allocation2]  }
  0x2c   : > { %p739_p9 = scmp.ne.s32.totalorder %s890_s11, %s738_s26  ;;  %s743_s28 = sshll.u32 %s796_s27, 4  ;;  %s744_s28 = int_to_ptr.vmem [resolvable:$false] %s743_s28 }
  0x2d   : > { %s745_s29 = scalar_lea.vmem %s744_s28, 1024  ;;  %p746_p13 = scmp.lt.s32.totalorder %s890_s11, %s744_s28 }
  0x2e   : > { %p741_p10 = pnand %p739_p9, %p727_p12  ;;  %p747_p1 = scmp.lt.s32.totalorder %s745_s29, %s738_s26 }
  0x30   : > { %p742_p11 = pneg %p741_p10  ;;  %p748_p4 = por %p747_p1, %p746_p13 }
  0x32   : > { %p749_p5 = pnand %p748_p4, %p742_p11 }
  0x34   : > { %752 = shalt.err (!%p749_p5)
}
  0x35   : > { %s797_s4 = smov 256   ;;  %s798_s5 = smov 16  }
  0x36   : > { %655 = dma.hbm_to_vmem [thread:$0]  (!%p892_p7), %s888_s9, 512, %s890_s11, %s896_s19, %s797_s4, %s797_s4, %s798_s5  }
  0x37   : > { %p1109_p12 = scmp.ne.s32.totalorder %s1106_s18, 0 }
  0x38   : > { %s182_s6 = sand.u32 (!%p1109_p12), 1, %s783_s13   ;;  %p1110_p1 = scmp.ne.s32.totalorder (!%p1109_p12), %s1105_s17, 0 }
  0x39   : > { %180 = sbr.rel (%p1109_p12) target bundleno = 653 (0x28d), region = 32  ;;  %s561_s7 = sshll.u32 (!%p1109_p12), %s182_s6, 5 }
  0x3a   : > { %s183_s8 = scalar_lea.sflag (!%p1109_p12), [#allocation3], %s182_s6  ;;  %s920_s10 = scalar_lea.vmem (!%p1109_p12), [#allocation2], %s561_s7 }
  0x3e   : > { %770 = dma.done.wait (%p1110_p1), %s183_s8, 512  }
  0x3f   : > { %772 = vsyncadd (%p1110_p1), %s183_s8, 4294966784  ;;  %p1111_p4 = scmp.eq.s32.totalorder %s839_s16, 0 }
  0x41   : > { %774 = dma.done.wait (%p1111_p4), [#allocation5], 4096   ;;  %p1112_p5 = pmov %p1111_p4 }
  0x42   : > { %v799_v0 = vmov 0   ;;  %v930_v1 = vld [vmem:[#allocation4 + $0xf8] sm:$0xff]  ;;  %v934_v3 = vld [vmem:[#allocation4 + $0xf0] sm:$0xff]  ;;  %v942_v5 = vld [vmem:[#allocation4 + $0xe8] sm:$0xff]  ;;  %s563_s17 = sshll.u32 %s839_s16, 1  ;;  %s565_s15 = sshll.u32 %s839_s16, 4 }
  0x43   : > { %776 = vsyncadd (%p1112_p5), [#allocation5], 4294963200  ;;  %697 = vset.pattern.permute.xlu1 %v799_v0  ;;  %698 = vset.pattern.permute.xlu0 %v799_v0  ;;  %v932_v2 = vld [vmem:[#allocation4 + $0x78] sm:$0xff]  ;;  %v938_v4 = vld [vmem:[#allocation4 + $0x70] sm:$0xff]  ;;  %p1007_p7 = scmp.lt.s32.totalorder %s563_s17, 3  ;;  %vm455_vm4 = vcmask 7168  }
  0x44   : > { %570 = vmatprep.subr.mxu0 %v930_v1  ;;  %608 = vmatprep.subr.mxu1 %v930_v1  ;;  %v946_v6 = vld [vmem:[#allocation4 + $0x68] sm:$0xff]  ;;  %v950_v7 = vld [vmem:[#allocation4 + $0xe0] sm:$0xff]  ;;  %v958_v9 = vld [vmem:[#allocation4 + $0xd8] sm:$0xff]  ;;  %p223_p0 = scmp.lt.s32.totalorder %s839_s16, 1  ;;  %vm469_vm5 = vcmask 0  }
  0x45   : > { %571 = vmatpush3.msra.mxu0 %v932_v2  ;;  %624 = vmatpush3.msra.mxu1 %v932_v2  ;;  %v954_v8 = vld [vmem:[#allocation4 + $0x60] sm:$0xff]  ;;  %v962_v10 = vld [vmem:[#allocation4 + $0x58] sm:$0xff]  ;;  %v966_v11 = vld [vmem:[#allocation4 + $0xd0] sm:$0xff]  ;;  %s1119_s17 = smov (!%p1007_p7, %s563_s17), 3 }
  0x46   : > { %572 = vmatprep.subr.mxu0 %v934_v3  ;;  %609 = vmatprep.subr.mxu1 %v934_v3  ;;  %v970_v12 = vld [vmem:[#allocation4 + $0x50] sm:$0xff]  ;;  %v972_v13 = vld [vmem:[#allocation4 + $0x8] sm:$0xff]  ;;  %v982_v17 = vld [vmem:[#allocation4] sm:$0xff]  ;;  %s564_s9 = sshll.u32 %s1119_s17, 3  ;;  %v285_v56 = vmul.f32 %v962_v10, %v962_v10  ;;  %v286_v59 = vmul.f32 %v954_v8, %v954_v8  ;;  %s1121_s16 = smov (!%p223_p0, %s839_s16), 1 }
  0x47   : > { %573 = vmatpush3.msra.mxu0 %v938_v4  ;;  %625 = vmatpush3.msra.mxu1 %v938_v4  ;;  %v976_v14 = vld [vmem:[#allocation4 + $0xc8] sm:$0xff]  ;;  %v978_v15 = vld [vmem:[#allocation4 + $0x10] sm:$0xff]  ;;  %v275_v16 = vmul.f32 %v972_v13, %v972_v13  ;;  %v274_v20 = vmul.f32 %v982_v17, %v982_v17  ;;  %v992_v21 = vld [vmem:[#allocation4 + $0xc0] sm:$0xff]  ;;  %v284_v48 = vmul.f32 %v970_v12, %v970_v12  ;;  %s221_s19 = scalar_lea.vmem %s1099_s1, %s564_s9  ;;  %s225_s23 = scalar_lea.vmem %s1101_s3, %s1121_s16 }
  0x48   : > { %574 = vmatprep.subr.mxu0 %v942_v5  ;;  %610 = vmatprep.subr.mxu1 %v942_v5  ;;  %v239_v18 = vld [vmem:[#allocation4 + $0x48] sm:$0xff]  ;;  %v276_v19 = vmul.f32 %v978_v15, %v978_v15  ;;  %v233_v22 = vld [vmem:[#allocation4 + $0x18] sm:$0xff]  ;;  %v238_v23 = vld [vmem:[#allocation4 + $0x40] sm:$0xff] }
  0x49   : > { %575 = vmatpush3.msra.mxu0 %v946_v6  ;;  %626 = vmatpush3.msra.mxu1 %v946_v6  ;;  %v277_v24 = vmul.f32 %v233_v22, %v233_v22  ;;  %v306_v25 = vadd.f32 %v275_v16, %v274_v20  ;;  %v996_v26 = vld [vmem:[#allocation4 + $0xb8] sm:$0xff]  ;;  %v234_v27 = vld [vmem:[#allocation4 + $0x20] sm:$0xff]  ;;  %v1001_v31 = vld [vmem:[#allocation4 + $0xb0] sm:$0xff]  ;;  %v282_v43 = vmul.f32 %v238_v23, %v238_v23 }
  0x4a   : > { %576 = vmatprep.subr.mxu0 %v950_v7  ;;  %611 = vmatprep.subr.mxu1 %v950_v7  ;;  %v237_v28 = vld [vmem:[#allocation4 + $0x38] sm:$0xff]  ;;  %v278_v29 = vmul.f32 %v234_v27, %v234_v27  ;;  %v235_v32 = vld [vmem:[#allocation4 + $0x28] sm:$0xff]  ;;  %v236_v33 = vld [vmem:[#allocation4 + $0x30] sm:$0xff]  ;;  %v283_v46 = vmul.f32 %v239_v18, %v239_v18 }
  0x4b   : > { %577 = vmatpush3.msra.mxu0 %v954_v8  ;;  %627 = vmatpush3.msra.mxu1 %v954_v8  ;;  %v307_v30 = vadd.f32 %v306_v25, %v276_v19  ;;  %v279_v34 = vmul.f32 %v235_v32, %v235_v32  ;;  %v1005_v36 = vld [vmem:[#allocation4 + $0xa8] sm:$0xff]  ;;  %v280_v37 = vmul.f32 %v236_v33, %v236_v33  ;;  %v1013_v39 = vld [vmem:[#allocation4 + $0xa0] sm:$0xff]  ;;  %v1017_v42 = vld [vmem:[#allocation4 + $0x98] sm:$0xff] }
  0x4c   : > { %578 = vmatprep.subr.mxu0 %v958_v9  ;;  %612 = vmatprep.subr.mxu1 %v958_v9  ;;  %v281_v40 = vmul.f32 %v237_v28, %v237_v28  ;;  %v248_v45 = vld [vmem:[#allocation4 + $0x90] sm:$0xff]  ;;  %v247_v49 = vld [vmem:[#allocation4 + $0x88] sm:$0xff]  ;;  %v226_v51 = vld [vmem:[%s920_s10] sm:$0xff] }
  0x4d   : > { %579 = vmatpush3.msra.mxu0 %v962_v10  ;;  %628 = vmatpush3.msra.mxu1 %v962_v10  ;;  %v308_v35 = vadd.f32 %v307_v30, %v277_v24  ;;  %v227_v50 = vld [vmem:[%s920_s10 + $0x8] sm:$0xff]  ;;  %v264_v54 = vmul.f32 %v226_v51, %v226_v51  ;;  %v246_v55 = vld [vmem:[#allocation4 + $0x80] sm:$0xff]  ;;  %v229_v58 = vld [vmem:[%s920_s10 + $0x18] sm:$0xff] }
  0x4e   : > { %580 = vmatprep.subr.mxu0 %v966_v11  ;;  %613 = vmatprep.subr.mxu1 %v966_v11  ;;  %v265_v53 = vmul.f32 %v227_v50, %v227_v50  ;;  %v267_v60 = vmul.f32 %v229_v58, %v229_v58  ;;  %v228_v61 = vld [vmem:[%s920_s10 + $0x10] sm:$0xff]  ;;  %v262_v10 = vld [vmem:[%s221_s19] sm:$0xff]  ;;  %v290_v20 = vmul.f32 %v246_v55, %v246_v55 }
  0x4f   : > { %581 = vmatpush3.msra.mxu0 %v970_v12  ;;  %629 = vmatpush3.msra.mxu1 %v970_v12  ;;  %v309_v38 = vadd.f32 %v308_v35, %v278_v29  ;;  %v266_v63 = vmul.f32 %v228_v61, %v228_v61  ;;  %v287_v12 = vmul.f32 %v946_v6, %v946_v6 }
  0x50   : > { %582 = vmatprep.subr.mxu0 %v976_v14  ;;  %614 = vmatprep.subr.mxu1 %v976_v14  ;;  %v268_v0 = vadd.f32 %v265_v53, %v264_v54  ;;  %v291_v6 = vmul.f32 %v247_v49, %v247_v49 }
  0x51   : > { %583 = vmatpush3.msra.mxu0 %v239_v18  ;;  %630 = vmatpush3.msra.mxu1 %v239_v18  ;;  %v310_v41 = vadd.f32 %v309_v38, %v279_v34  ;;  %v271_v16 = vadd.f32 %v267_v60, %v266_v63  ;;  %v263_v18 = vld [vmem:[%s221_s19 + $0x8] sm:$0xff]  ;;  %v297_v34 = vmul.f32 %v996_v26, %v996_v26 }
  0x52   : > { %584 = vmatprep.subr.mxu0 %v992_v21  ;;  %615 = vmatprep.subr.mxu1 %v992_v21 }
  0x53   : > { %585 = vmatpush3.msra.mxu0 %v238_v23  ;;  %631 = vmatpush3.msra.mxu1 %v238_v23  ;;  %v311_v44 = vadd.f32 %v310_v41, %v280_v37  ;;  %v298_v37 = vmul.f32 %v992_v21, %v992_v21  ;;  %v303_v21 = vmul.f32 %v942_v5, %v942_v5 }
  0x54   : > { %586 = vmatprep.subr.mxu0 %v996_v26  ;;  %616 = vmatprep.subr.mxu1 %v996_v26  ;;  %v302_v26 = vmul.f32 %v950_v7, %v950_v7 }
  0x55   : > { %587 = vmatpush3.msra.mxu0 %v237_v28  ;;  %632 = vmatpush3.msra.mxu1 %v237_v28  ;;  %v312_v47 = vadd.f32 %v311_v44, %v281_v40  ;;  %v294_v28 = vmul.f32 %v1013_v39, %v1013_v39 }
  0x56   : > { %588 = vmatprep.subr.mxu0 %v1001_v31  ;;  %617 = vmatprep.subr.mxu1 %v1001_v31 }
  0x57   : > { %589 = vmatpush3.msra.mxu0 %v236_v33  ;;  %633 = vmatpush3.msra.mxu1 %v236_v33  ;;  %v313_v52 = vadd.f32 %v312_v47, %v282_v43 }
  0x58   : > { %590 = vmatprep.subr.mxu0 %v1005_v36  ;;  %618 = vmatprep.subr.mxu1 %v1005_v36 }
  0x59   : > { %591 = vmatpush3.msra.mxu0 %v235_v32  ;;  %634 = vmatpush3.msra.mxu1 %v235_v32  ;;  %v314_v57 = vadd.f32 %v313_v52, %v283_v46  ;;  %v296_v32 = vmul.f32 %v1001_v31, %v1001_v31  ;;  %v301_v31 = vmul.f32 %v958_v9, %v958_v9 }
  0x5a   : > { %592 = vmatprep.subr.mxu0 %v1013_v39  ;;  %619 = vmatprep.subr.mxu1 %v1013_v39  ;;  %v299_v39 = vmul.f32 %v976_v14, %v976_v14  ;;  %v304_v14 = vmul.f32 %v934_v3, %v934_v3 }
  0x5b   : > { %593 = vmatpush3.msra.mxu0 %v234_v27  ;;  %635 = vmatpush3.msra.mxu1 %v234_v27  ;;  %v315_v62 = vadd.f32 %v314_v57, %v284_v48  ;;  %v292_v27 = vmul.f32 %v248_v45, %v248_v45 }
  0x5c   : > { %594 = vmatprep.subr.mxu0 %v1017_v42  ;;  %620 = vmatprep.subr.mxu1 %v1017_v42 }
  0x5d   : > { %595 = vmatpush3.msra.mxu0 %v233_v22  ;;  %636 = vmatpush3.msra.mxu1 %v233_v22  ;;  %v316_v8 = vadd.f32 %v315_v62, %v285_v56 }
  0x5e   : > { %596 = vmatprep.subr.mxu0 %v248_v45  ;;  %621 = vmatprep.subr.mxu1 %v248_v45 }
  0x5f   : > { %597 = vmatpush3.msra.mxu0 %v978_v15  ;;  %637 = vmatpush3.msra.mxu1 %v978_v15  ;;  %v317_v15 = vadd.f32 %v316_v8, %v286_v59 }
  0x60   : > { %598 = vmatprep.subr.mxu0 %v247_v49  ;;  %622 = vmatprep.subr.mxu1 %v247_v49 }
  0x61   : > { %599 = vmatpush3.msra.mxu0 %v972_v13  ;;  %638 = vmatpush3.msra.mxu1 %v972_v13  ;;  %v288_v13 = vmul.f32 %v938_v4, %v938_v4  ;;  %v318_v19 = vadd.f32 %v317_v15, %v287_v12  ;;  %v293_v4 = vmul.f32 %v1017_v42, %v1017_v42 }
  0x62   : > { %600 = vmatprep.subr.mxu0 %v246_v55  ;;  %623 = vmatprep.subr.mxu1 %v246_v55  ;;  %v424_v55 = vlaneseq }
  0x63   : > { %601 = vmatpush3.msra.mxu0 %v982_v17  ;;  %639 = vmatpush3.msra.mxu1 %v982_v17  ;;  %v289_v17 = vmul.f32 %v932_v2, %v932_v2  ;;  %v319_v22 = vadd.f32 %v318_v19, %v288_v13  ;;  %v295_v2 = vmul.f32 %v1005_v36, %v1005_v36 }
  0x64   : > { %407 = vmatprep.mubr.f32.mxu0 %v227_v50  ;;  %412 = vmatprep.mubr.f32.mxu1 %v229_v58  ;;  %v300_v36 = vmul.f32 %v966_v11, %v966_v11  ;;  %v305_v11 = vmul.f32 %v930_v1, %v930_v1 }
  0x65   : > { %408 = vmatmul.mubr.f32.vlgmr.msra.gmra.mxu0 %v226_v51  ;;  %413 = vmatmul.mubr.f32.vlgmr.msra.gmra.mxu1 %v228_v61  ;;  %v320_v23 = vadd.f32 %v319_v22, %v289_v17  ;;  %v425_v61 = vand.u32 127, %v424_v55  ;;  %v448_v17 = vstv %s565_s15 }
  0x66   : > { %269 = vadd.xlane.f32.xlu0 %v268_v0  ;;  %427 = vperm.xlu1 %697, %v262_v10  }
  0x67   : > { %v321_v24 = vadd.f32 %v320_v23, %v290_v20 }
  0x69   : > { %v322_v25 = vadd.f32 %v321_v24, %v291_v6 }
  0x6a   : > { %272 = vadd.xlane.f32.xlu0 %v271_v16  ;;  %430 = vperm.xlu1 %697, %v263_v18   ;;  %v446_v16 = vshrl.u32 %v424_v55, 7 }
  0x6b   : > { %v323_v29 = vadd.f32 %v322_v25, %v292_v27 }
  0x6c   : > { %v447_v18 = vadd.s32 8, %v446_v16  ;;  %v449_v20 = vadd.s32 %v448_v17, %v446_v16 }
  0x6d   : > { %v324_v30 = vadd.f32 %v323_v29, %v293_v4 }
  0x6e   : > { %v450_v19 = vadd.s32 %v448_v17, %v447_v18  ;;  %vm451_vm3 = vcmp.lt.s32.totalorder %v449_v20, 20 }
  0x6f   : > { %v325_v33 = vadd.f32 %v324_v30, %v294_v28 }
  0x70   : > { %vm452_vm2 = vcmp.lt.s32.totalorder %v450_v19, 20 }
  0x71   : > { %v326_v35 = vadd.f32 %v325_v33, %v295_v2 }
  0x73   : > { %v327_v38 = vadd.f32 %v326_v35, %v296_v32 }
  0x75   : > { %v328_v40 = vadd.f32 %v327_v38, %v297_v34 }
  0x77   : > { %v329_v41 = vadd.f32 %v328_v40, %v298_v37 }
  0x79   : > { %v330_v42 = vadd.f32 %v329_v41, %v299_v39 }
  0x7b   : > { %v331_v43 = vadd.f32 %v330_v42, %v300_v36 }
  0x7d   : > { %v332_v44 = vadd.f32 %v331_v43, %v301_v31 }
  0x7f   : > { %v333_v45 = vadd.f32 %v332_v44, %v302_v26 }
  0x81   : > { %v334_v46 = vadd.f32 %v333_v45, %v303_v21 }
  0x83   : > { %v335_v47 = vadd.f32 %v334_v46, %v304_v14 }
  0x85   : > { %v336_v48 = vadd.f32 %v335_v47, %v305_v11 }
  0x87   : > { %v337_v9 = vrot.slane %v336_v48, 4 }
  0x89   : > { %v338_v49 = vadd.f32 %v337_v9, %v336_v48 }
  0x8b   : > { %v339_v50 = vrot.slane %v338_v49, 2 }
  0x8d   : > { %v340_v51 = vadd.f32 %v339_v50, %v338_v49 }
  0x8f   : > { %v341_v7 = vrot.slane %v340_v51, 1 }
  0x91   : > { %v342_v59 = vadd.f32 %v341_v7, %v340_v51 }
  0xe1   : > { %v428_v5 = vpop.permute.xlu1 %427 }
  0xe2   : > { %vm432_vm0 = vcmp.eq.s32.totalorder %v428_v5, %v425_v61 }
  0xe5   : > { %v431_v0 = vpop.permute.xlu1 %430 }
  0xe6   : > { %vm433_vm1 = vcmp.eq.s32.totalorder %v431_v0, %v425_v61 }
  0xef   : > { %v270_v52 = vpop.xlane.xlu0 %269 }
  0xf3   : > { %v273_v62 = vpop.xlane.xlu0 %272 }
 0x125   : > { %v602_v53 = vpop.f32.mrf.mxu0  ;;  %v605_v54 = vpop.f32.mrf.mxu1 }
 0x127   : > { %v603_v56 = vpop.f32.mrf.mxu0  ;;  %v606_v57 = vpop.f32.mrf.mxu1 }
 0x128   : > { %v604_v3 = vadd.f32 %v603_v56, %v602_v53  ;;  %v607_v58 = vadd.f32 %v606_v57, %v605_v54 }
 0x12a   : > { %v418_v60 = vmul.f32 2.0, %v604_v3  ;;  %v419_v1 = vmul.f32 2.0, %v607_v58 }
 0x12c   : > { %v420_v63 = vsub.f32 %v342_v59, %v418_v60  ;;  %v421_v10 = vsub.f32 %v342_v59, %v419_v1 }
 0x12e   : > { %v422_v12 = vadd.f32 %v420_v63, %v270_v52  ;;  %v423_v8 = vadd.f32 %v421_v10, %v273_v62 }
 0x130   : > { %v434_v13 = vsel %vm432_vm0, %v422_v12, 0.0  ;;  %v435_v15 = vsel %vm433_vm1, %v423_v8, 0.0 }
 0x131   : > { %436 = vadd.xlane.f32.xlu0 %v434_v13  ;;  %438 = vadd.xlane.f32.xlu1 %v435_v15 }
 0x1ba   : > { %v439_v22 = vpop.xlane.xlu1 %438  ;;  %v437_v6 = vpop.xlane.xlu0 %436 }
 0x1bb   : > { %v441_v23 = vmax.f32 %v439_v22, 1e-12  ;;  %v440_v24 = vmax.f32 %v437_v6, 1e-12 }
 0x1bd   : > { %v443_v25 = vmin.f32 %v441_v23, 1e+12  ;;  %v442_v27 = vmin.f32 %v440_v24, 1e+12 }
 0x1bf   : > { %v454_v4 = vsel %vm452_vm2, %v443_v25, 0.0  ;;  %v453_v28 = vsel %vm451_vm3, %v442_v27, 0.0 }
 0x1c0   : > { %v456_v29 = vsel %vm455_vm4, %v453_v28, 0.0  ;;  %v457_v2 = vsel %vm455_vm4, %v454_v4, 0.0 }
 0x1c1   : > { %v458_v30 = vadd.f32 %v457_v2, %v456_v29 }
 0x1c3   : > { %459 = vadd.xlane.f32.xlu0 %v458_v30 }
 0x24c   : > { %v460_v32 = vpop.xlane.xlu0 %459 }
 0x24d   : > { %v461_v33 = vrot.slane %v460_v32, 4 }
 0x24f   : > { %v462_v34 = vadd.f32 %v461_v33, %v460_v32 }
 0x251   : > { %v463_v35 = vrot.slane %v462_v34, 2 }
 0x253   : > { %v464_v37 = vadd.f32 %v463_v35, %v462_v34 }
 0x255   : > { %v465_v38 = vrot.slane %v464_v37, 1 }
 0x257   : > { %v466_v39 = vadd.f32 %v465_v38, %v464_v37 }
 0x259   : > { %640 = vpush %v466_v39 }
 0x28a   : > { %s641_s24 = spop %640 }
 0x28b   : > { %v468_v40 = vstv %s641_s24 }
 0x28c   : > { %470 = vst.msk [vmem:[%s225_s23] sm:$0x1] %vm469_vm5, %v468_v40 }
 0x28d PF: > { %p14_p2 = scmp.ge.s32.totalorder %s864_s22, 4   ;;  %s1114_s12 = smov %s783_s13 }
 0x28e   : > { %s1115_s13 = smov %s787_s14  ;;  %s1116_s14 = smov %s881_s30 }
 0x28f   : > { %s1117_s15 = smov %s864_s22  ;;  %16 = sbr.rel (!%p14_p2) target bundleno = 4 (0x4), region = 79 }
 0x294   :  { %488 = vsyncpa [#allocation3], 1 }
 0x295   :  { %490 = vsyncpa [#allocation3 + $0x1], 1 }
 0x296   :  { %491 = vsyncpa [#allocation5], 1 }

</bundles_post_ra>
